<compile_context>
chip_gen: v7x
topology: tpu7x:2x2x1
jax: 0.10.0
libtpu: 0.0.40
codegen_flags: <defaults>
</compile_context>

<pallas_src>
import functools

import jax
import jax.numpy as jnp
from jax.experimental import pallas as pl
from jax.experimental.pallas import tpu as pltpu


def _sdpa_kernel(q_ref, k_ref, v_ref, out_ref, attn_ref, logattn_ref, *,
                 inv_temperature: float):
    # Refs are (bb, tq, D) / (bb, Lk, D) / (bb, Lk, Dv) blocks.
    # Fold 1/temperature into q (Lq*D elements vs Lq*Lk scores).
    q = q_ref[...] * jnp.asarray(inv_temperature, dtype=q_ref.dtype)
    k = k_ref[...]
    v = v_ref[...]

    # s = q @ k^T: contract the last dims directly on the MXU (no transpose),
    # f32 accumulation.
    s = jnp.einsum("bqd,bkd->bqk", q, k,
                   preferred_element_type=jnp.float32)        # (bb, tq, Lk)

    # Numerically stable softmax / log_softmax along the key axis.
    m = jnp.max(s, axis=-1, keepdims=True)                    # (bb, tq, 1)
    z = s - m
    e = jnp.exp(z)                                            # (bb, tq, Lk)
    denom = jnp.sum(e, axis=-1, keepdims=True)                # (bb, tq, 1)

    # Store log_softmax immediately (shortens the live f32 set).
    logattn_ref[...] = (z - jnp.log(denom)).astype(logattn_ref.dtype)

    # Exact reciprocal on a tiny (bb, tq, 1) tensor: rows sum to 1 and
    # attn == exp(log_attn), matching torch semantics.
    inv_denom = 1.0 / denom
    attn_ref[...] = (e * inv_denom).astype(attn_ref.dtype)

    # output = softmax @ v, computed as (e @ v) * inv_denom so the normalizing
    # scale runs over Dv instead of Lk and e's live range ends at the matmul.
    out = jnp.einsum("bqk,bkd->bqd", e.astype(v.dtype), v,
                     preferred_element_type=jnp.float32)      # (bb, tq, Dv)
    out_ref[...] = (out * inv_denom).astype(out_ref.dtype)


def _divisors_desc(n):
    return [d for d in range(n, 0, -1) if n % d == 0]


def _round_up(x, m):
    return ((x + m - 1) // m) * m


def _padded_block_bytes(shape, itemsize):
    """VMEM bytes of a block, honoring (sublane, 128-lane) tile granularity."""
    sublane = 8 * max(1, 4 // itemsize)        # f32: 8, bf16: 16, int8: 32
    *lead, s2, s1 = shape
    n = 1
    for d in lead:
        n *= d
    return n * _round_up(max(s2, 1), sublane) * _round_up(max(s1, 1), 128) * itemsize


def _vmem_budget():
    """(block budget, vmem_limit_bytes) derived from the actual chip."""
    try:
        cap = int(pltpu.get_tpu_info().vmem_capacity_bytes)
    except Exception:
        cap = 64 << 20                         # conservative (v7x per-TC VMEM)
    budget = min(int(cap * 0.6), 96 << 20)     # ~44 MiB on v7x, ~76 MiB on v5e/v6e
    limit = min(cap, budget + (16 << 20))
    return budget, limit


def _pick_blocks(B, Lq, Lk, D, Dv, in_itemsize, out_itemsize, budget_bytes):
    """Largest (batch_block, q_block) whose padded, double-buffered footprint
    (including f32 intermediates) fits, preferring >= 2 total grid steps."""

    def footprint(bb, tq):
        ins = 2 * (_padded_block_bytes((bb, tq, D), in_itemsize)
                   + _padded_block_bytes((bb, Lk, D), in_itemsize)
                   + _padded_block_bytes((bb, Lk, Dv), in_itemsize))
        outs = 2 * (_padded_block_bytes((bb, tq, Dv), out_itemsize)
                    + 2 * _padded_block_bytes((bb, tq, Lk), out_itemsize))
        # f32 in-kernel score-shaped temporaries (s/z/e/attn) + the out temp.
        tmps = (4 * _padded_block_bytes((bb, tq, Lk), 4)
                + _padded_block_bytes((bb, tq, Dv), 4))
        return ins + outs + tmps

    sub = 8 * max(1, 4 // in_itemsize)         # sublane multiple for the q tile
    tq_candidates = [t for t in _divisors_desc(Lq) if t == Lq or t % sub == 0]
    if not tq_candidates:
        tq_candidates = [Lq]

    fitting = []
    for tq in tq_candidates:
        for bb in _divisors_desc(B):
            if footprint(bb, tq) <= budget_bytes:
                fitting.append((bb, tq))
    if not fitting:
        return 1, tq_candidates[-1]

    def n_steps(c):
        bb, tq = c
        return (B // bb) * (Lq // tq)

    def block_vol(c):
        bb, tq = c
        return bb * tq

    # >= 2 grid steps lets the parallel axes shard across v7x's two TensorCores.
    multi = [c for c in fitting if n_steps(c) >= 2]
    pool = multi if multi else fitting
    return max(pool, key=block_vol)


def scaled_dot_product_attention(q, k, v, temperature):
    """Pallas equivalent of ScaledDotProductAttention.forward (eval mode)."""
    B, Lq, D = q.shape
    Bk, Lk, Dk = k.shape
    Bv, Lkv, Dv = v.shape
    assert D == Dk and Bk == B and Bv == B and Lkv == Lk

    out_dtype = q.dtype  # torch bmm/softmax preserve the input dtype
    in_itemsize = jnp.dtype(q.dtype).itemsize
    out_itemsize = jnp.dtype(out_dtype).itemsize

    budget, vmem_limit = _vmem_budget()
    bb, tq = _pick_blocks(B, Lq, Lk, D, Dv, in_itemsize, out_itemsize, budget)

    kernel = functools.partial(
        _sdpa_kernel, inv_temperature=1.0 / float(temperature))

    grid = (B // bb, Lq // tq)
    grid_spec = pltpu.PrefetchScalarGridSpec(
        num_scalar_prefetch=0,
        grid=grid,
        in_specs=[
            pl.BlockSpec((bb, tq, D), lambda b, i: (b, i, 0)),
            # K/V index_map ignores the inner q axis -> resident across q tiles.
            pl.BlockSpec((bb, Lk, D), lambda b, i: (b, 0, 0)),
            pl.BlockSpec((bb, Lk, Dv), lambda b, i: (b, 0, 0)),
        ],
        out_specs=[
            pl.BlockSpec((bb, tq, Dv), lambda b, i: (b, i, 0)),
            pl.BlockSpec((bb, tq, Lk), lambda b, i: (b, i, 0)),
            pl.BlockSpec((bb, tq, Lk), lambda b, i: (b, i, 0)),
        ],
    )

    out_shapes = (
        jax.ShapeDtypeStruct((B, Lq, Dv), out_dtype),
        jax.ShapeDtypeStruct((B, Lq, Lk), out_dtype),
        jax.ShapeDtypeStruct((B, Lq, Lk), out_dtype),
    )

    cost = pl.CostEstimate(
        flops=2 * B * Lq * Lk * (D + Dv),
        transcendentals=B * Lq * (Lk + 1),
        bytes_accessed=(B * (Lq * D + Lk * D + Lk * Dv) * in_itemsize
                        + B * (Lq * Dv + 2 * Lq * Lk) * out_itemsize),
    )

    return pl.pallas_call(
        kernel,
        out_shape=out_shapes,
        grid_spec=grid_spec,
        cost_estimate=cost,
        compiler_params=pltpu.CompilerParams(
            dimension_semantics=("parallel", "parallel"),
            vmem_limit_bytes=vmem_limit),
    )(q, k, v)


def _reference(q, k, v, temperature):
    attn = jnp.einsum("bqd,bkd->bqk", q, k) / temperature
    log_attn = jax.nn.log_softmax(attn, axis=2)
    attn = jax.nn.softmax(attn, axis=2)
    output = jnp.einsum("bqk,bkd->bqd", attn, v)
    return output, attn, log_attn


if __name__ == "__main__":
    # Small shapes consistent with the module's bmm-based forward.
    B, Lq, Lk, D, Dv = 2, 8, 8, 32, 32
    temperature = float(jnp.sqrt(jnp.float32(D)))  # typical usage: sqrt(d_k)

    key = jax.random.PRNGKey(0)
    kq, kk, kv = jax.random.split(key, 3)
    q = jax.random.normal(kq, (B, Lq, D), dtype=jnp.float32)
    k = jax.random.normal(kk, (B, Lk, D), dtype=jnp.float32)
    v = jax.random.normal(kv, (B, Lk, Dv), dtype=jnp.float32)

    out, attn, log_attn = scaled_dot_product_attention(q, k, v, temperature)
    jax.block_until_ready((out, attn, log_attn))

    # Sanity check against a pure-JAX reference (tolerance covers MXU f32
    # matmul pass differences; the softmax itself is exact now).
    ref_out, ref_attn, ref_log_attn = _reference(q, k, v, temperature)
    assert jnp.allclose(out, ref_out, atol=2e-3, rtol=2e-3)
    assert jnp.allclose(attn, ref_attn, atol=2e-3, rtol=2e-3)
    assert jnp.allclose(log_attn, ref_log_attn, atol=2e-3, rtol=2e-3)
    # Torch-parity invariants restored by the exact softmax divide.
    assert jnp.allclose(jnp.sum(attn, axis=-1), 1.0, atol=1e-5)
    assert jnp.allclose(attn, jnp.exp(log_attn), atol=1e-5)

    print("KERNEL_OK")
</pallas_src>

<mosaic_0001>
module attributes {stable_mosaic.version = 11 : i64} {
  func.func @_sdpa_kernel(%arg0: i32, %arg1: i32, %arg2: memref<1x8x32xf32, #tpu.memory_space<vmem>>, %arg3: memref<1x8x32xf32, #tpu.memory_space<vmem>>, %arg4: memref<1x8x32xf32, #tpu.memory_space<vmem>>, %arg5: memref<1x8x32xf32, #tpu.memory_space<vmem>>, %arg6: memref<1x8x8xf32, #tpu.memory_space<vmem>>, %arg7: memref<1x8x8xf32, #tpu.memory_space<vmem>>) attributes {dimension_semantics = [#tpu.dimension_semantics<parallel>, #tpu.dimension_semantics<parallel>], iteration_bounds = array<i64: 2, 1>, scalar_prefetch = 0 : i64, scratch_operands = 0 : i64, tpu.core_type = #tpu.core_type<tc>, window_params = [{transform_indices = @transform_0, window_bounds = array<i64: 1, 8, 32>}, {transform_indices = @transform_1, window_bounds = array<i64: 1, 8, 32>}, {transform_indices = @transform_2, window_bounds = array<i64: 1, 8, 32>}, {transform_indices = @transform_3, window_bounds = array<i64: 1, 8, 32>}, {transform_indices = @transform_4, window_bounds = array<i64: 1, 8, 8>}, {transform_indices = @transform_5, window_bounds = array<i64: 1, 8, 8>}]} {
    %c0 = arith.constant 0 : index
    %c0_0 = arith.constant 0 : index
    %c0_1 = arith.constant 0 : index
    %0 = vector.load %arg2[%c0, %c0_0, %c0_1] : memref<1x8x32xf32, #tpu.memory_space<vmem>>, vector<1x8x32xf32>
    %cst = arith.constant 0.176776692 : f32
    %1 = vector.broadcast %cst : f32 to vector<1x8x32xf32>
    %2 = arith.mulf %0, %1 : vector<1x8x32xf32>
    %c0_2 = arith.constant 0 : index
    %c0_3 = arith.constant 0 : index
    %c0_4 = arith.constant 0 : index
    %3 = vector.load %arg3[%c0_2, %c0_3, %c0_4] : memref<1x8x32xf32, #tpu.memory_space<vmem>>, vector<1x8x32xf32>
    %c0_5 = arith.constant 0 : index
    %c0_6 = arith.constant 0 : index
    %c0_7 = arith.constant 0 : index
    %4 = vector.load %arg4[%c0_5, %c0_6, %c0_7] : memref<1x8x32xf32, #tpu.memory_space<vmem>>, vector<1x8x32xf32>
    "tpu.trace_start"() <{level = 10 : i32, message = "bqd,bkd->bqk"}> : () -> ()
    %cst_8 = arith.constant dense<0.000000e+00> : vector<1x8x8xf32>
    %5 = tpu.matmul %2, %3, %cst_8 {dimension_numbers = #tpu.dot_dimension_numbers<[2], [2], [1], [1], [0, 0, 0, 1, 1, 1], [0], [0]>} : vector<1x8x32xf32>, vector<1x8x32xf32>, vector<1x8x8xf32> -> vector<1x8x8xf32>
    "tpu.trace_stop"() : () -> ()
    %cst_9 = arith.constant dense<0xFF800000> : vector<1x8xf32>
    %6 = vector.multi_reduction <maximumf>, %5, %cst_9 [2] : vector<1x8x8xf32> to vector<1x8xf32>
    %7 = vector.shape_cast %6 : vector<1x8xf32> to vector<1x8x1xf32>
    %8 = vector.broadcast %7 : vector<1x8x1xf32> to vector<1x8x8xf32>
    %9 = arith.subf %5, %8 : vector<1x8x8xf32>
    %10 = math.exp %9 : vector<1x8x8xf32>
    %cst_10 = arith.constant dense<0.000000e+00> : vector<1x8xf32>
    %11 = vector.multi_reduction <add>, %10, %cst_10 [2] : vector<1x8x8xf32> to vector<1x8xf32>
    %12 = vector.shape_cast %11 : vector<1x8xf32> to vector<1x8x1xf32>
    %13 = math.log %12 : vector<1x8x1xf32>
    %14 = vector.broadcast %13 : vector<1x8x1xf32> to vector<1x8x8xf32>
    %15 = arith.subf %9, %14 : vector<1x8x8xf32>
    %c0_11 = arith.constant 0 : index
    %c0_12 = arith.constant 0 : index
    %c0_13 = arith.constant 0 : index
    %16 = vector.load %arg7[%c0_11, %c0_12, %c0_13] : memref<1x8x8xf32, #tpu.memory_space<vmem>>, vector<1x8x8xf32>
    tpu.vector_store %arg7[%c0_11, %c0_12, %c0_13], %15 {strides = array<i32>} : memref<1x8x8xf32, #tpu.memory_space<vmem>>, vector<1x8x8xf32>,
    %cst_14 = arith.constant 1.000000e+00 : f32
    %17 = vector.broadcast %cst_14 : f32 to vector<1x8x1xf32>
    %18 = arith.divf %17, %12 : vector<1x8x1xf32>
    %19 = vector.broadcast %18 : vector<1x8x1xf32> to vector<1x8x8xf32>
    %20 = arith.mulf %10, %19 : vector<1x8x8xf32>
    %c0_15 = arith.constant 0 : index
    %c0_16 = arith.constant 0 : index
    %c0_17 = arith.constant 0 : index
    %21 = vector.load %arg6[%c0_15, %c0_16, %c0_17] : memref<1x8x8xf32, #tpu.memory_space<vmem>>, vector<1x8x8xf32>
    tpu.vector_store %arg6[%c0_15, %c0_16, %c0_17], %20 {strides = array<i32>} : memref<1x8x8xf32, #tpu.memory_space<vmem>>, vector<1x8x8xf32>,
    "tpu.trace_start"() <{level = 10 : i32, message = "bqk,bkd->bqd"}> : () -> ()
    %cst_18 = arith.constant dense<0.000000e+00> : vector<1x8x32xf32>
    %22 = tpu.matmul %10, %4, %cst_18 {dimension_numbers = #tpu.dot_dimension_numbers<[2], [1], [1], [2], [0, 0, 0, 1, 1, 2], [0], [0]>} : vector<1x8x8xf32>, vector<1x8x32xf32>, vector<1x8x32xf32> -> vector<1x8x32xf32>
    "tpu.trace_stop"() : () -> ()
    %23 = vector.broadcast %18 : vector<1x8x1xf32> to vector<1x8x32xf32>
    %24 = arith.mulf %22, %23 : vector<1x8x32xf32>
    %c0_19 = arith.constant 0 : index
    %c0_20 = arith.constant 0 : index
    %c0_21 = arith.constant 0 : index
    %25 = vector.load %arg5[%c0_19, %c0_20, %c0_21] : memref<1x8x32xf32, #tpu.memory_space<vmem>>, vector<1x8x32xf32>
    tpu.vector_store %arg5[%c0_19, %c0_20, %c0_21], %24 {strides = array<i32>} : memref<1x8x32xf32, #tpu.memory_space<vmem>>, vector<1x8x32xf32>,
    return
  }
  func.func @transform_0(%arg0: i32, %arg1: i32) -> (i32, i32, i32) {
    %c0_i32 = arith.constant 0 : i32
    %c0_i32_0 = arith.constant 0 : i32
    return %arg0, %arg1, %c0_i32 : i32, i32, i32
  }
  func.func @transform_1(%arg0: i32, %arg1: i32) -> (i32, i32, i32) {
    %c0_i32 = arith.constant 0 : i32
    %c0_i32_0 = arith.constant 0 : i32
    %c0_i32_1 = arith.constant 0 : i32
    return %arg0, %c0_i32, %c0_i32_0 : i32, i32, i32
  }
  func.func @transform_2(%arg0: i32, %arg1: i32) -> (i32, i32, i32) {
    %c0_i32 = arith.constant 0 : i32
    %c0_i32_0 = arith.constant 0 : i32
    %c0_i32_1 = arith.constant 0 : i32
    return %arg0, %c0_i32, %c0_i32_0 : i32, i32, i32
  }
  func.func @transform_3(%arg0: i32, %arg1: i32) -> (i32, i32, i32) {
    %c0_i32 = arith.constant 0 : i32
    %c0_i32_0 = arith.constant 0 : i32
    return %arg0, %arg1, %c0_i32 : i32, i32, i32
  }
  func.func @transform_4(%arg0: i32, %arg1: i32) -> (i32, i32, i32) {
    %c0_i32 = arith.constant 0 : i32
    %c0_i32_0 = arith.constant 0 : i32
    return %arg0, %arg1, %c0_i32 : i32, i32, i32
  }
  func.func @transform_5(%arg0: i32, %arg1: i32) -> (i32, i32, i32) {
    %c0_i32 = arith.constant 0 : i32
    %c0_i32_0 = arith.constant 0 : i32
    return %arg0, %arg1, %c0_i32 : i32, i32, i32
  }
}

</mosaic_0001>

<bundles_post_ra>
// kernel: tpu_custom_call.1
= control target key start
LH: loop header
LB: loop body
LE: loop exit
PB: predicated region body
PF: predicated region fallthrough
CT: control target
= control target key end

     0   :  { %s1526_s0 = inlined_call_operand.hbm [shape: f32[2,8,32], index: 0, kind: input, shape index: {}]   ;;  %s1527_s1 = inlined_call_operand.hbm [shape: f32[2,8,32], index: 1, kind: input, shape index: {}]   ;;  %s1528_s2 = inlined_call_operand.hbm [shape: f32[2,8,32], index: 2, kind: input, shape index: {}]   ;;  %s1529_s3 = inlined_call_operand.hbm [shape: f32[2,8,32], index: 3, kind: output, shape index: {0}]   ;;  %s1530_s4 = inlined_call_operand.hbm [shape: f32[2,8,8], index: 4, kind: output, shape index: {1}]   ;;  %s1531_s5 = inlined_call_operand.hbm [shape: f32[2,8,8], index: 5, kind: output, shape index: {2}]  }
   0x1   :  { %1542 = sst [smem:[#allocation21_spill]] %s1527_s1 }
   0x2   :  { %11 = vsyncpa [#allocation3], 0 }
   0x3   :  { %13 = vsyncpa [#allocation3 + $0x1], 0 }
   0x4   :  { %14 = vsyncpa [#allocation6], 0 }
   0x5   :  { %16 = vsyncpa [#allocation6 + $0x1], 0 }
   0x6   :  { %17 = vsyncpa [#allocation4], 0 }
   0x7   :  { %19 = vsyncpa [#allocation4 + $0x1], 0 }
   0x8   :  { %20 = vsyncpa [#allocation10], 0 }
   0x9   :  { %22 = vsyncpa [#allocation10 + $0x1], 0  ;;  %s1171_s18 = smov 0   ;;  %s1173_s19 = smov 0  }
   0xa   :  { %s1175_s20 = smov 0   ;;  %s1177_s21 = smov 0  }
   0xb   :  { %s1179_s22 = smov 0   ;;  %s1181_s23 = smov 0  }
   0xc LB: > { %1543 = sst [smem:[#allocation16_spill]] %s1127_s22  ;;  %s1202_s24 = sadd.s32 4294967295, %s1131_s23   ;;  %s1131_s23 = sphi %s1181_s23, %s28_s23   ;;  %s1127_s22 = sphi %s1179_s22, %s1570_s22   ;;  %s1123_s21 = sphi %s1177_s21, %s1569_s21   ;;  %s1119_s20 = sphi %s1175_s20, %s1573_s20   ;;  %s1115_s19 = sphi %s1173_s19, %s1572_s19   ;;  %s1111_s18 = sphi %s1171_s18, %s1571_s18  }
   0xd   : > { %1544 = sst [smem:[#allocation17_spill]] %s1131_s23  ;;  %s1532_s25 = sadd.s32 4294967294, %s1131_s23  }
   0xe   : > { %s40_s26 = sadd.s32 1, %s1127_s22  ;;  %s49_s27 = sadd.s32 1, %s1119_s20 }
   0xf   : > { %p42_p0 = scmp.ge.s32.totalorder %s40_s26, 2  ;;  %p56_p1 = scmp.ne.s32.totalorder %s1119_s20, %s1115_s19 }
  0x10   : > { %p57_p2 = scmp.eq.s32.totalorder %s1131_s23, 0  ;;  %p62_p3 = scmp.ne.s32.totalorder %s1115_s19, %s1111_s18 }
  0x11   : > { %s1575_s26 = smov (%p42_p0, %s40_s26), 0  ;;  %p63_p5 = scmp.eq.s32.totalorder %s1202_s24, 0 }
  0x12   : > { %1545 = sst [smem:[#allocation18_spill]] %s1575_s26  ;;  %p1214_p4 = por %p57_p2, %p56_p1 }
  0x13   : > { %s44_s29 = ssub.s32 %s1127_s22, %s1575_s26  ;;  %p140_p6 = scmp.eq.s32.totalorder %s1202_s24, 1 }
  0x14   : > { %p47_p7 = scmp.eq.s32.totalorder %s44_s29, 0  ;;  %p1222_p8 = por %p63_p5, %p62_p3 }
  0x15   : > { %p1226_p9 = por %p140_p6, %p56_p1  ;;  %p146_p10 = scmp.eq.s32.totalorder %s1532_s25, 1 }
  0x16   : > { %s1547_s30 = scalar_select %p1222_p8, 1, 0 }
  0x17   : > { %s1548_s6 = scalar_select %p1226_p9, 1, 0 }
  0x18   : > { %s1233_s7 = scalar_select %p47_p7, %s1119_s20, %s49_s27  }
  0x19   : > { %p1235_p11 = por %p146_p10, %p62_p3  ;;  %p837_p13 = scmp.lt.s32.totalorder %s1131_s23, 2 }
  0x1a   : > { %1549 = sst [smem:[#allocation19_spill]] %s1233_s7  ;;  %s1533_s9 = sand.u32 1, %s1119_s20  }
  0x1b   : > { %s1550_s8 = scalar_select %p1235_p11, 1, 0 }
  0x1c   : > { %s1244_s10 = sshll.u32 %s1533_s9, 3  ;;  %s1247_s11 = sshll.u32 %s1127_s22, 7 }
  0x1d   : > { %1551 = sst [smem:[#allocation20_spill]] %s1550_s8  ;;  %p1251_p0 = pnand %p837_p13, %p1214_p4 }
  0x1e   : > { %s241_s13 = sand.u32 1, %s1131_s23   ;;  %s1553_s1 = sld [smem:[#allocation21_spill]] }
  0x1f   : > { %s1552_s12 = scalar_select %p1251_p0, 1, 0 }
  0x20   : > { %s245_s17 = scalar_lea.vmem [#allocation5], %s1244_s10  ;;  %s1267_s28 = scalar_lea.sflag [#allocation6], %s241_s13 }
  0x21   : > { %s252_s27 = sshll.u32 %s245_s17, 4  ;;  %p1273_p4 = pneg %p1251_p0  ;;  %s1264_s27 = int_to_ptr.vmem [resolvable:$true] %s252_s27 }
  0x24   : > { %s1260_s16 = scalar_lea.hbm %s1553_s1, %s1247_s11  ;;  %s900_s17 = scalar_lea.hbm %s1553_s1, 256 }
  0x25   : > { %s895_s29 = scalar_lea.hbm %s1260_s16, 128  ;;  %p901_p7 = scmp.lt.u32.totalorder %s1260_s16, %s1553_s1 }
  0x26   : > { %p896_p3 = scmp.ne.s32.totalorder %s1260_s16, %s895_s29  ;;  %p902_p10 = scmp.lt.u32.totalorder %s900_s17, %s895_s29 }
  0x27   : > { %p904_p12 = scmp.lt.u32.totalorder %s895_s29, %s1260_s16 }
  0x28   : > { %p898_p5 = pnand %p1273_p4, %p896_p3  ;;  %p903_p13 = por %p902_p10, %p901_p7 }
  0x2a   : > { %p899_p6 = pneg %p898_p5  ;;  %p905_p1 = por %p904_p12, %p903_p13 }
  0x2c   : > { %p906_p2 = pnand %p905_p1, %p899_p6 }
  0x2e   : > { %909 = shalt.err (!%p906_p2)
}
  0x2f   : > { %s910_s13 = scalar_lea.vmem %s1264_s27, 128  ;;  %s1133_s14 = smov [#allocation5]  }
  0x30   : > { %p911_p3 = scmp.ne.s32.totalorder %s1264_s27, %s910_s13  ;;  %s915_s15 = sshll.u32 %s1133_s14, 4  ;;  %s916_s15 = int_to_ptr.vmem [resolvable:$false] %s915_s15 }
  0x31   : > { %s917_s26 = scalar_lea.vmem %s916_s15, 256  ;;  %p918_p9 = scmp.lt.s32.totalorder %s1264_s27, %s916_s15 }
  0x32   : > { %p913_p5 = pnand %p911_p3, %p1273_p4  ;;  %p919_p8 = scmp.lt.s32.totalorder %s917_s26, %s910_s13 }
  0x34   : > { %p914_p11 = pneg %p913_p5  ;;  %p920_p7 = por %p919_p8, %p918_p9 }
  0x36   : > { %p921_p10 = pnand %p920_p7, %p914_p11 }
  0x38   : > { %924 = shalt.err (!%p921_p10)
}
  0x39   : > { %823 = dma.hbm_to_vmem [thread:$0]  (!%p1251_p0), %s1260_s16, 128, %s1264_s27, %s1267_s28  }
  0x3a   : > { %p1555_p12 = scmp.lt.s32.totalorder %s1131_s23, 3  ;;  %p1556_p1 = scmp.ge.s32.totalorder %s1131_s23, 1 }
  0x3b   : > { %s1309_s13 = scalar_lea.hbm %s1526_s0, %s1247_s11  ;;  %s226_s14 = scalar_lea.vmem [#allocation2], %s1244_s10 }
  0x3c   : > { %p1301_p2 = pnand %p1556_p1, %p1555_p12  ;;  %s234_s15 = sshll.u32 %s226_s14, 4  ;;  %s1312_s15 = int_to_ptr.vmem [resolvable:$true] %s234_s15 }
  0x3d   : > { %s1318_s26 = scalar_lea.hbm %s1528_s2, %s1247_s11  ;;  %s1558_s1 = sand.u32 1, %s1119_s20  }
  0x3e   : > { %s1557_s9 = scalar_select %p1301_p2, 1, 0 }
  0x3f   : > { %s223_s22 = scalar_lea.sflag [#allocation3], %s1558_s1  ;;  %s925_s7 = scalar_lea.hbm %s1309_s13, 128 }
  0x40   : > { %p926_p8 = scmp.ne.s32.totalorder %s1309_s13, %s925_s7  ;;  %s930_s23 = scalar_lea.hbm %s1526_s0, 256 }
  0x41   : > { %p931_p6 = scmp.lt.u32.totalorder %s1309_s13, %s1526_s0  ;;  %p932_p13 = scmp.lt.u32.totalorder %s930_s23, %s925_s7 }
  0x42   : > { %p928_p9 = pnand %p926_p8, %p1273_p4  ;;  %p934_p5 = scmp.lt.u32.totalorder %s925_s7, %s1309_s13 }
  0x43   : > { %p933_p3 = por %p932_p13, %p931_p6 }
  0x44   : > { %p929_p11 = pneg %p928_p9 }
  0x45   : > { %p935_p7 = por %p934_p5, %p933_p3 }
  0x47   : > { %p936_p10 = pnand %p935_p7, %p929_p11 }
  0x49   : > { %939 = shalt.err (!%p936_p10)
}
  0x4a   : > { %s940_s1 = scalar_lea.vmem %s1312_s15, 128  ;;  %s1134_s11 = smov [#allocation2]  }
  0x4b   : > { %p941_p12 = scmp.ne.s32.totalorder %s1312_s15, %s940_s1  ;;  %s945_s16 = sshll.u32 %s1134_s11, 4  ;;  %s946_s16 = int_to_ptr.vmem [resolvable:$false] %s945_s16 }
  0x4c   : > { %s947_s8 = scalar_lea.vmem %s946_s16, 256  ;;  %p948_p9 = scmp.lt.s32.totalorder %s1312_s15, %s946_s16 }
  0x4d   : > { %p943_p1 = pnand %p941_p12, %p1273_p4  ;;  %p949_p2 = scmp.lt.s32.totalorder %s947_s8, %s940_s1 }
  0x4f   : > { %p944_p8 = pneg %p943_p1  ;;  %p950_p6 = por %p949_p2, %p948_p9 }
  0x51   : > { %p951_p13 = pnand %p950_p6, %p944_p8 }
  0x53   : > { %954 = shalt.err (!%p951_p13)
}
  0x54   : > { %820 = dma.hbm_to_vmem [thread:$0]  (!%p1251_p0), %s1309_s13, 128, %s1312_s15, %s223_s22  }
  0x55   : > { %s263_s23 = scalar_lea.vmem [#allocation7], %s1244_s10  ;;  %s955_s27 = scalar_lea.hbm %s1318_s26, 128 }
  0x56   : > { %s270_s7 = sshll.u32 %s263_s23, 4  ;;  %p956_p11 = scmp.ne.s32.totalorder %s1318_s26, %s955_s27  ;;  %s271_s7 = int_to_ptr.vmem [resolvable:$true] %s270_s7 }
  0x57   : > { %s960_s14 = scalar_lea.hbm %s1528_s2, 256  ;;  %p961_p5 = scmp.lt.u32.totalorder %s1318_s26, %s1528_s2 }
  0x58   : > { %p958_p2 = pnand %p956_p11, %p1273_p4  ;;  %p962_p7 = scmp.lt.u32.totalorder %s960_s14, %s955_s27 }
  0x59   : > { %p964_p12 = scmp.lt.u32.totalorder %s955_s27, %s1318_s26 }
  0x5a   : > { %p959_p3 = pneg %p958_p2  ;;  %p963_p10 = por %p962_p7, %p961_p5 }
  0x5c   : > { %p965_p1 = por %p964_p12, %p963_p10 }
  0x5e   : > { %p966_p8 = pnand %p965_p1, %p959_p3 }
  0x60   : > { %969 = shalt.err (!%p966_p8)
}
  0x61   : > { %s970_s22 = scalar_lea.vmem %s271_s7, 128  ;;  %s1135_s10 = smov [#allocation7]  }
  0x62   : > { %p971_p9 = scmp.ne.s32.totalorder %s271_s7, %s970_s22  ;;  %s975_s13 = sshll.u32 %s1135_s10, 4  ;;  %s976_s13 = int_to_ptr.vmem [resolvable:$false] %s975_s13 }
  0x63   : > { %s977_s15 = scalar_lea.vmem %s976_s13, 256  ;;  %p978_p11 = scmp.lt.s32.totalorder %s271_s7, %s976_s13 }
  0x64   : > { %p973_p6 = pnand %p971_p9, %p1273_p4  ;;  %p979_p2 = scmp.lt.s32.totalorder %s977_s15, %s970_s22 }
  0x66   : > { %p974_p13 = pneg %p973_p6  ;;  %p980_p0 = por %p979_p2, %p978_p11 }
  0x68   : > { %p981_p5 = pnand %p980_p0, %p974_p13 }
  0x6a   : > { %984 = shalt.err (!%p981_p5)
}
  0x6b   : > { %p1559_p7 = scmp.ne.s32.totalorder %s1552_s12, 0  ;;  %p1560_p3 = scmp.ne.s32.totalorder %s1557_s9, 0 }
  0x6c   : > { %s1365_s25 = sand.u32 (!%p1560_p3), 1, %s1115_s19   ;;  %p1561_p0 = scmp.ne.s32.totalorder (!%p1560_p3), %s1547_s30, 0 }
  0x6d   : > { %826 = dma.hbm_to_vmem [thread:$0]  (!%p1559_p7), %s1318_s26, 128, %s271_s7, %s1267_s28  }
  0x6e   : > { %279 = sbr.rel (%p1560_p3) target bundleno = 725 (0x2d5), region = 32  ;;  %s1368_s16 = sshll.u32 (!%p1560_p3), %s1365_s25, 3 }
  0x6f   : > { %s282_s8 = scalar_lea.sflag (!%p1560_p3), [#allocation3], %s1365_s25  ;;  %s285_s23 = scalar_lea.vmem (!%p1560_p3), [#allocation2], %s1368_s16 }
  0x75   : > { %1094 = dma.done.wait (%p1561_p0), %s282_s8, 128  }
  0x76   : > { %1096 = vsyncadd (%p1561_p0), %s282_s8, 4294967168  ;;  %s290_s12 = sand.u32 1, %s1202_s24   ;;  %s294_s9 = scalar_lea.vmem [#allocation5], %s1368_s16 }
  0x77   : > { %s291_s28 = scalar_lea.sflag [#allocation6], %s290_s12 }
  0x78   : > { %1098 = dma.done.wait (%p1561_p0), %s291_s28, 256  }
  0x79   : > { %1100 = vsyncadd (%p1561_p0), %s291_s28, 4294967040  ;;  %v1136_v0 = vmov 0.0   ;;  %vm1137_vm0 = vmmov 0   ;;  %vm354_vm1 = vcmask 261120   ;;  %v352_v1 = vld [vmem:[%s294_s9] sm:$0xff]  ;;  %v350_v2 = vld [vmem:[%s285_s23] sm:$0xff] }
  0x7a   : > { %795 = vmatprep.subr.mxu0 %v1136_v0  ;;  %797 = vmatprep.mubr.msk.f32.mxu0 %vm1137_vm0, %v1136_v0  ;;  %v351_v3 = vmul.f32 0.17677669, %v350_v2  ;;  %vm431_vm2 = vcmask 64512   ;;  %s303_s30 = scalar_lea.vmem [#allocation7], %s1368_s16  ;;  %s1391_s26 = sshll.u32 %s1123_s21, 7 }
  0x7b   : > { %800 = vmatprep.subr.mxu1 %v1136_v0  ;;  %802 = vmatprep.mubr.msk.f32.mxu1 %vm1137_vm0, %v1136_v0  ;;  %v353_v7 = vld [vmem:[%s303_s30] sm:$0xff]  ;;  %s342_s7 = scalar_lea.vmem [#allocation9], %s1368_s16  ;;  %s349_s29 = scalar_lea.vmem [#allocation11], %s1368_s16 }
  0x7c   : > { %796 = vmatpush3.xpose.msk.msra.mxu0 %vm354_vm1, %v352_v1  ;;  %801 = vmatpush3.msra.mxu1 %v353_v7  ;;  %s563_s27 = sshll.u32 %s342_s7, 4  ;;  %s577_s17 = sshll.u32 %s349_s29, 4  ;;  %s1406_s27 = int_to_ptr.vmem [resolvable:$true] %s563_s27  ;;  %s1414_s17 = int_to_ptr.vmem [resolvable:$true] %s577_s17 }
  0x7d   : > { %s1404_s11 = scalar_lea.hbm %s1530_s4, %s1391_s26  ;;  %s1412_s10 = scalar_lea.hbm %s1531_s5, %s1391_s26 }
  0x7e   : > { %s1419_s13 = scalar_lea.sflag [#allocation10], %s290_s12  ;;  %s985_s15 = scalar_lea.vmem %s1406_s27, 128 }
  0x7f   : > { %798 = vmatmul.mubr.msk.f32.vlgmr.msra.gmra.mrb[0].mxu0 %vm354_vm1, %v351_v3  ;;  %p986_p4 = scmp.ne.s32.totalorder %s1406_s27, %s985_s15  ;;  %p1562_p10 = scmp.ne.s32.totalorder %s1548_s6, 0 }
  0x80   : > { %s1138_s8 = smov [#allocation9]  }
  0x81   : > { %p987_p12 = pnand %p986_p4, %p1562_p10  ;;  %s989_s23 = sshll.u32 %s1138_s8, 4  ;;  %s990_s23 = int_to_ptr.vmem [resolvable:$false] %s989_s23 }
  0x82   : > { %s991_s28 = scalar_lea.vmem %s990_s23, 256  ;;  %p992_p8 = scmp.lt.s32.totalorder %s1406_s27, %s990_s23 }
  0x83   : > { %p988_p1 = pneg %p987_p12  ;;  %p993_p9 = scmp.lt.s32.totalorder %s991_s28, %s985_s15 }
  0x85   : > { %p994_p6 = por %p993_p9, %p992_p8 }
  0x87   : > { %p995_p13 = pnand %p994_p6, %p988_p1 }
 0x152   : > { %v427_v4 = vpop.f32.mrb[0].mxu0 }
 0x153   : > { %v799_v5 = vpop.f32.mrb[1].mxu0  ;;  %v432_v6 = vsel %vm431_vm2, %v427_v4, -inf }
 0x154   : > { %433 = vmax.xlane.f32.xlu0 %v432_v6 }
 0x1e1   : > { %v434_v8 = vpop.xlane.xlu0 %433 }
 0x1e2   : > { %v435_v9 = vsub.f32 %v427_v4, %v434_v8 }
 0x1e4   : > { %v436_v10 = vmul.f32 1.442695, %v435_v9 }
 0x1e6   : > { %889 = vpow2.f32 %v436_v10 }
 0x1f0   : > { %v890_v11 = vpop.eup %889 }
 0x1f1   : > { %803 = vmatmul.mubr.msk.f32.vlgmr.msra.gmra.mrb[0].mxu1 %vm431_vm2, %v890_v11  ;;  %v438_v12 = vsel %vm431_vm2, %v890_v11, 0.0 }
 0x1f2   : > { %439 = vadd.xlane.f32.xlu0 %v438_v12 }
 0x27f   : > { %v440_v13 = vpop.xlane.xlu0 %439 }
 0x280   : > { %891 = vlog2.f32 %v440_v13 }
 0x281   : > { %893 = vrcp.f32 %v440_v13 }
 0x28a   : > { %v892_v14 = vpop.eup %891 }
 0x28b   : > { %v1397_v15 = vpop.eup %893  ;;  %v442_v16 = vmul.f32 0.6931472, %v892_v14 }
 0x28c   : > { %v447_v17 = vmul.f32 %v1397_v15, %v890_v11 }
 0x28d   : > { %v443_v18 = vsub.f32 %v435_v9, %v442_v16 }
 0x28e   : > { %448 = vst.msk [vmem:[%s342_s7] sm:$0xff] %vm431_vm2, %v447_v17 }
 0x28f   : > { %998 = shalt.err (!%p995_p13)
}
 0x290   : > { %s999_s24 = scalar_lea.hbm %s1404_s11, 128  ;;  %s1003_s30 = scalar_lea.hbm %s1530_s4, 256 }
 0x291   : > { %p1000_p11 = scmp.ne.s32.totalorder %s1404_s11, %s999_s24  ;;  %p1004_p7 = scmp.lt.u32.totalorder %s1404_s11, %s1530_s4 }
 0x292   : > { %p1005_p3 = scmp.lt.u32.totalorder %s1003_s30, %s999_s24  ;;  %p1007_p4 = scmp.lt.u32.totalorder %s999_s24, %s1404_s11 }
 0x293   : > { %p1001_p2 = pnand %p1000_p11, %p1562_p10 }
 0x294   : > { %p1006_p0 = por %p1005_p3, %p1004_p7 }
 0x295   : > { %p1002_p5 = pneg %p1001_p2 }
 0x296   : > { %p1008_p12 = por %p1007_p4, %p1006_p0 }
 0x298   : > { %p1009_p1 = pnand %p1008_p12, %p1002_p5 }
 0x29a   : > { %1012 = shalt.err (!%p1009_p1)
}
 0x29b   : > { %812 = dma.vmem_to_hbm [thread:$0]  (%p1562_p10), %s1406_s27, 128, %s1404_s11, %s1419_s13   ;;  %444 = vst.msk [vmem:[%s349_s29] sm:$0xff] %vm431_vm2, %v443_v18 }
 0x29c   : > { %s1013_s1 = scalar_lea.vmem %s1414_s17, 128  ;;  %s1139_s21 = smov [#allocation11]  }
 0x29d   : > { %p1014_p8 = scmp.ne.s32.totalorder %s1414_s17, %s1013_s1  ;;  %s1017_s22 = sshll.u32 %s1139_s21, 4  ;;  %s1018_s22 = int_to_ptr.vmem [resolvable:$false] %s1017_s22 }
 0x29e   : > { %s1019_s15 = scalar_lea.vmem %s1018_s22, 256  ;;  %p1020_p13 = scmp.lt.s32.totalorder %s1414_s17, %s1018_s22 }
 0x29f   : > { %p1015_p9 = pnand %p1014_p8, %p1562_p10  ;;  %p1021_p11 = scmp.lt.s32.totalorder %s1019_s15, %s1013_s1 }
 0x2a1   : > { %p1016_p6 = pneg %p1015_p9  ;;  %p1022_p2 = por %p1021_p11, %p1020_p13 }
 0x2a3   : > { %p1023_p5 = pnand %p1022_p2, %p1016_p6 }
 0x2a5   : > { %1026 = shalt.err (!%p1023_p5)
}
 0x2a6   : > { %s1027_s27 = scalar_lea.hbm %s1412_s10, 128  ;;  %s1031_s8 = scalar_lea.hbm %s1531_s5, 256 }
 0x2a7   : > { %p1028_p7 = scmp.ne.s32.totalorder %s1412_s10, %s1027_s27  ;;  %p1032_p4 = scmp.lt.u32.totalorder %s1412_s10, %s1531_s5 }
 0x2a8   : > { %p1033_p12 = scmp.lt.u32.totalorder %s1031_s8, %s1027_s27  ;;  %p1035_p8 = scmp.lt.u32.totalorder %s1027_s27, %s1412_s10 }
 0x2a9   : > { %p1029_p3 = pnand %p1028_p7, %p1562_p10 }
 0x2aa   : > { %p1034_p1 = por %p1033_p12, %p1032_p4 }
 0x2ab   : > { %p1030_p0 = pneg %p1029_p3 }
 0x2ac   : > { %p1036_p9 = por %p1035_p8, %p1034_p1 }
 0x2ae   : > { %p1037_p6 = pnand %p1036_p9, %p1030_p0 }
 0x2b0   : > { %1040 = shalt.err (!%p1037_p6)
}
 0x2b1   : > { %813 = dma.vmem_to_hbm [thread:$0]  (%p1562_p10), %s1414_s17, 128, %s1412_s10, %s1419_s13  }
 0x2b2   : > { %s335_s24 = scalar_lea.vmem [#allocation8], %s1368_s16  ;;  %s1474_s7 = scalar_lea.hbm %s1529_s3, %s1391_s26 }
 0x2b3   : > { %s549_s12 = sshll.u32 %s335_s24, 4  ;;  %s525_s14 = scalar_lea.sflag [#allocation4], %s1365_s25  ;;  %s1476_s12 = int_to_ptr.vmem [resolvable:$true] %s549_s12 }
 0x2b4   : > { %s1041_s17 = scalar_lea.vmem %s1476_s12, 128  ;;  %s1140_s16 = smov [#allocation8]  }
 0x2b5   : > { %p1042_p13 = scmp.ne.s32.totalorder %s1476_s12, %s1041_s17  ;;  %s1045_s10 = sshll.u32 %s1140_s16, 4  ;;  %s1046_s10 = int_to_ptr.vmem [resolvable:$false] %s1045_s10 }
 0x2b6   : > { %s1047_s13 = scalar_lea.vmem %s1046_s10, 256  ;;  %p1048_p5 = scmp.lt.s32.totalorder %s1476_s12, %s1046_s10 }
 0x2b7   : > { %p1043_p11 = pnand %p1042_p13, %p1562_p10  ;;  %p1049_p7 = scmp.lt.s32.totalorder %s1047_s13, %s1041_s17 }
 0x2b9   : > { %p1044_p2 = pneg %p1043_p11  ;;  %p1050_p3 = por %p1049_p7, %p1048_p5 }
 0x2bb   : > { %p1051_p0 = pnand %p1050_p3, %p1044_p2 }
 0x2c4   : > { %v518_v19 = vpop.f32.mrb[0].mxu1 }
 0x2c5   : > { %v522_v20 = vmul.f32 %v1397_v15, %v518_v19  ;;  %v804_v21 = vpop.f32.mrb[1].mxu1 }
 0x2c7   : > { %523 = vst.msk [vmem:[%s335_s24] sm:$0xff] %vm354_vm1, %v522_v20 }
 0x2c8   : > { %1054 = shalt.err (!%p1051_p0)
}
 0x2c9   : > { %s1055_s25 = scalar_lea.hbm %s1474_s7, 128  ;;  %s1059_s21 = scalar_lea.hbm %s1529_s3, 256 }
 0x2ca   : > { %p1056_p4 = scmp.ne.s32.totalorder %s1474_s7, %s1055_s25  ;;  %p1060_p8 = scmp.lt.u32.totalorder %s1474_s7, %s1529_s3 }
 0x2cb   : > { %p1061_p9 = scmp.lt.u32.totalorder %s1059_s21, %s1055_s25  ;;  %p1063_p13 = scmp.lt.u32.totalorder %s1055_s25, %s1474_s7 }
 0x2cc   : > { %p1057_p12 = pnand %p1056_p4, %p1562_p10 }
 0x2cd   : > { %p1062_p6 = por %p1061_p9, %p1060_p8 }
 0x2ce   : > { %p1058_p1 = pneg %p1057_p12 }
 0x2cf   : > { %p1064_p11 = por %p1063_p13, %p1062_p6 }
 0x2d1   : > { %p1065_p2 = pnand %p1064_p11, %p1058_p1 }
 0x2d3   : > { %1068 = shalt.err (!%p1065_p2)
}
 0x2d4   : > { %811 = dma.vmem_to_hbm [thread:$0]  (%p1562_p10), %s1476_s12, 128, %s1474_s7, %s525_s14  }
 0x2d5 PF: > { %s1563_s27 = sld [smem:[#allocation20_spill]]  ;;  %s1564_s29 = sld [smem:[#allocation17_spill]] }
 0x2d6   : > { %s589_s11 = sand.u32 1, %s1111_s18  }
 0x2d7   : > { %s590_s8 = scalar_lea.sflag [#allocation4], %s589_s11 }
 0x2db   : > { %p1565_p5 = scmp.ne.s32.totalorder %s1563_s27, 0  ;;  %p1566_p7 = scmp.ge.s32.totalorder %s1564_s29, 2 }
 0x2dd   : > { %p828_p3 = pnand %p1566_p7, %p1565_p5 }
 0x2df   : > { %1102 = dma.done.wait (!%p828_p3), %s590_s8, 128  }
 0x2e0   : > { %1104 = vsyncadd (!%p828_p3), %s590_s8, 4294967168  ;;  %s1567_s23 = sadd.s32 4294967294, %s1564_s29  }
 0x2e1   : > { %s598_s28 = sand.u32 1, %s1567_s23  }
 0x2e2   : > { %s599_s24 = scalar_lea.sflag [#allocation10], %s598_s28 }
 0x2e3   : > { %1106 = dma.done.wait (!%p828_p3), %s599_s24, 256  }
 0x2e4   : > { %1108 = vsyncadd (!%p828_p3), %s599_s24, 4294967040  ;;  %s28_s23 = sadd.s32 1, %s1564_s29   ;;  %s1568_s6 = sld [smem:[#allocation19_spill]] }
 0x2e5   : > { %p25_p10 = scmp.ge.s32.totalorder %s28_s23, 4   ;;  %s1569_s21 = sld [smem:[#allocation16_spill]] }
 0x2e6   : > { %s1570_s22 = sld [smem:[#allocation18_spill]]  ;;  %s1571_s18 = smov %s1115_s19 }
 0x2e7   : > { %s1572_s19 = smov %s1119_s20  ;;  %27 = sbr.rel (!%p25_p10) target bundleno = 12 (0xc), region = 133 }
 0x2ea   : > { %s1573_s20 = smov %s1568_s6 }
 0x2ee   :  { %613 = vsyncpa [#allocation3], 1 }
 0x2ef   :  { %615 = vsyncpa [#allocation3 + $0x1], 1 }
 0x2f0   :  { %616 = vsyncpa [#allocation6], 1 }
 0x2f1   :  { %618 = vsyncpa [#allocation6 + $0x1], 1 }
 0x2f2   :  { %619 = vsyncpa [#allocation4], 1 }
 0x2f3   :  { %621 = vsyncpa [#allocation4 + $0x1], 1 }
 0x2f4   :  { %622 = vsyncpa [#allocation10], 1 }
 0x2f5   :  { %624 = vsyncpa [#allocation10 + $0x1], 1 }

</bundles_post_ra>
